<compile_context>
chip_gen: v7x
topology: tpu7x:2x2x1
jax: 0.10.0
libtpu: 0.0.40
codegen_flags: <defaults>
</compile_context>

<pallas_src>
import functools

import jax
import jax.numpy as jnp
from jax.experimental import pallas as pl
from jax.experimental.pallas import tpu as pltpu


def _temporal_conv_kernel(x0_ref, x1_ref, w0_ref, w1_ref, b_ref, o_ref):
    # x0_ref/x1_ref: (C_in, tile_s)  -- the two temporal taps, spatial on the lane axis
    # w0_ref/w1_ref: (C_out, C_in)   -- resident (weight-stationary) per-tap weights
    # b_ref        : (C_out, 1)
    # o_ref        : (C_out, tile_s) = relu(W0 @ X0 + W1 @ X1 + b)
    acc = jnp.dot(w0_ref[...], x0_ref[...],
                  preferred_element_type=jnp.float32,
                  precision=jax.lax.Precision.HIGHEST)
    acc = acc + jnp.dot(w1_ref[...], x1_ref[...],
                        preferred_element_type=jnp.float32,
                        precision=jax.lax.Precision.HIGHEST)
    acc = acc + b_ref[...]                      # (C_out, 1) broadcasts over lanes
    o_ref[...] = jnp.maximum(acc, 0.0).astype(o_ref.dtype)


@functools.partial(jax.jit, static_argnames=("dia",))
def temporal_conv_layer(x, weight, bias, dia=1):
    """Forward of TemporalConvLayer.

    x:      (N, C_in, H, W)       float32, NCHW (PyTorch convention)
    weight: (C_out, C_in, 2, 1)   PyTorch Conv2d OIHW
    bias:   (C_out,)
    """
    N, C_in, H, W = x.shape
    C_out = weight.shape[0]
    stride = 9  # matches nn.Conv2d(c_in, c_out, (2,1), 9, dilation=dia)

    H_out = (H - dia - 1) // stride + 1
    W_out = (W - 1) // stride + 1
    assert H_out >= 1 and W_out >= 1, "input too small for kernel/stride/dilation"

    # --- glue: strided gather of the two temporal taps (no transposes, no concat) ---
    h_hi = stride * (H_out - 1) + 1
    w_hi = stride * (W_out - 1) + 1
    S = H_out * W_out
    tap0 = x[:, :, 0:h_hi:stride, 0:w_hi:stride].reshape(N, C_in, S)
    tap1 = x[:, :, dia:dia + h_hi:stride, 0:w_hi:stride].reshape(N, C_in, S)
    # TODO(synk): fold this stride-9/dilated gather into the kernel itself (x kept in HBM
    # via memory_space=pl.ANY, scalar-prefetched SMEM row table of 9*h / 9*h+dia offsets,
    # double-buffered row DMAs with pltpu.make_async_copy, in-kernel lane subsample).
    # BlockSpec index_map cannot express the intra-block stride-9 W subsample, so this
    # remains an XLA producer; it only touches the ~2*H_out needed rows of x.

    # Per-tap weights (C_out, C_in) and bias (C_out, 1) stay resident in VMEM.
    w0 = weight[:, :, 0, 0]
    w1 = weight[:, :, 1, 0]
    b = bias.reshape(C_out, 1)

    # --- tiling: largest lane-dense spatial tile that fits the VMEM budget -------------
    # Double-buffered per-step blocks: 2 taps + 1 output, all f32.
    vmem_limit = 32 * 1024 * 1024                    # safe scoped limit on v5e/v6e/v7x
    bytes_per_lane = 4 * (2 * 2 * C_in + 2 * C_out)  # dbl-buffered x0,x1 + dbl-buffered out
    budget_cap = ((int(vmem_limit * 0.6) // bytes_per_lane) // 128) * 128
    cap = max(128, min(4096, budget_cap))
    # Full S in one tile if it fits (full-dim block needs no 128 alignment); otherwise a
    # 128-multiple tile, with the ragged final tile handled by Pallas masking.
    tile_s = S if S <= cap else cap

    grid = (N, pl.cdiv(S, tile_s))

    out = pl.pallas_call(
        _temporal_conv_kernel,
        out_shape=jax.ShapeDtypeStruct((N, C_out, S), x.dtype),
        grid=grid,
        in_specs=[
            pl.BlockSpec((None, C_in, tile_s), lambda n, j: (n, 0, j)),   # tap0
            pl.BlockSpec((None, C_in, tile_s), lambda n, j: (n, 0, j)),   # tap1
            pl.BlockSpec((C_out, C_in), lambda n, j: (0, 0)),             # w0 (resident)
            pl.BlockSpec((C_out, C_in), lambda n, j: (0, 0)),             # w1 (resident)
            pl.BlockSpec((C_out, 1), lambda n, j: (0, 0)),                # bias (resident)
        ],
        out_specs=pl.BlockSpec((None, C_out, tile_s), lambda n, j: (n, 0, j)),
        compiler_params=pltpu.CompilerParams(
            dimension_semantics=("parallel", "parallel"),
            vmem_limit_bytes=vmem_limit),
    )(tap0, tap1, w0, w1, b)

    return out.reshape(N, C_out, H_out, W_out)   # already NCHW, no transpose


if __name__ == "__main__":
    # small deterministic setup consistent with the module's forward
    c_in, c_out, dia = 4, 8, 2
    N, H, W = 2, 32, 16

    key = jax.random.PRNGKey(0)
    kx, kw, kb = jax.random.split(key, 3)

    x = jax.random.normal(kx, (N, c_in, H, W), dtype=jnp.float32)

    # PyTorch-style init bounds: fan_in = c_in * 2 * 1
    fan_in = c_in * 2 * 1
    bound = 1.0 / (fan_in ** 0.5)
    weight = jax.random.uniform(kw, (c_out, c_in, 2, 1),
                                minval=-bound, maxval=bound, dtype=jnp.float32)
    bias = jax.random.uniform(kb, (c_out,),
                              minval=-bound, maxval=bound, dtype=jnp.float32)

    out = temporal_conv_layer(x, weight, bias, dia=dia)
    out = jax.block_until_ready(out)

    # pure-JAX reference for a correctness sanity check (f32-exact path)
    ref = jax.lax.conv_general_dilated(
        x, weight, window_strides=(9, 9), padding="VALID",
        rhs_dilation=(dia, dia),
        dimension_numbers=("NCHW", "OIHW", "NCHW"),
        precision=jax.lax.Precision.HIGHEST)
    ref = jnp.maximum(ref + bias[None, :, None, None], 0.0)

    assert out.shape == ref.shape, (out.shape, ref.shape)
    assert jnp.allclose(out, ref, atol=1e-5, rtol=1e-5), \
        float(jnp.max(jnp.abs(out - ref)))

    print("KERNEL_OK")
</pallas_src>

<mosaic_0001>
module attributes {stable_mosaic.version = 11 : i64} {
  func.func @_temporal_conv_kernel(%arg0: i32, %arg1: i32, %arg2: memref<1x4x8xf32, #tpu.memory_space<vmem>>, %arg3: memref<1x4x8xf32, #tpu.memory_space<vmem>>, %arg4: memref<8x4xf32, #tpu.memory_space<vmem>>, %arg5: memref<8x4xf32, #tpu.memory_space<vmem>>, %arg6: memref<8x1xf32, #tpu.memory_space<vmem>>, %arg7: memref<1x8x8xf32, #tpu.memory_space<vmem>>) attributes {dimension_semantics = [#tpu.dimension_semantics<parallel>, #tpu.dimension_semantics<parallel>], iteration_bounds = array<i64: 2, 1>, scalar_prefetch = 0 : i64, scratch_operands = 0 : i64, tpu.core_type = #tpu.core_type<tc>, window_params = [{transform_indices = @transform_0, window_bounds = array<i64: 1, 4, 8>}, {transform_indices = @transform_1, window_bounds = array<i64: 1, 4, 8>}, {pipeline_mode = #tpu.pipeline_mode<synchronous>, transform_indices = @transform_2, window_bounds = array<i64: 8, 4>}, {pipeline_mode = #tpu.pipeline_mode<synchronous>, transform_indices = @transform_3, window_bounds = array<i64: 8, 4>}, {pipeline_mode = #tpu.pipeline_mode<synchronous>, transform_indices = @transform_4, window_bounds = array<i64: 8, 1>}, {transform_indices = @transform_5, window_bounds = array<i64: 1, 8, 8>}]} {
    %c0 = arith.constant 0 : index
    %c0_0 = arith.constant 0 : index
    %0 = vector.load %arg4[%c0, %c0_0] : memref<8x4xf32, #tpu.memory_space<vmem>>, vector<8x4xf32>
    %c0_1 = arith.constant 0 : index
    %c0_2 = arith.constant 0 : index
    %c0_3 = arith.constant 0 : index
    %1 = vector.load %arg2[%c0_1, %c0_2, %c0_3] : memref<1x4x8xf32, #tpu.memory_space<vmem>>, vector<1x4x8xf32>
    %2 = vector.shape_cast %1 : vector<1x4x8xf32> to vector<4x8xf32>
    %cst = arith.constant dense<0.000000e+00> : vector<8x8xf32>
    %3 = tpu.matmul %0, %2, %cst {dimension_numbers = #tpu.dot_dimension_numbers<[1], [0], [0], [1], [0, 0, 1, 1], [], []>, precision = #tpu.contract_precision<fp32>} : vector<8x4xf32>, vector<4x8xf32>, vector<8x8xf32> -> vector<8x8xf32>
    %c0_4 = arith.constant 0 : index
    %c0_5 = arith.constant 0 : index
    %4 = vector.load %arg5[%c0_4, %c0_5] : memref<8x4xf32, #tpu.memory_space<vmem>>, vector<8x4xf32>
    %c0_6 = arith.constant 0 : index
    %c0_7 = arith.constant 0 : index
    %c0_8 = arith.constant 0 : index
    %5 = vector.load %arg3[%c0_6, %c0_7, %c0_8] : memref<1x4x8xf32, #tpu.memory_space<vmem>>, vector<1x4x8xf32>
    %6 = vector.shape_cast %5 : vector<1x4x8xf32> to vector<4x8xf32>
    %cst_9 = arith.constant dense<0.000000e+00> : vector<8x8xf32>
    %7 = tpu.matmul %4, %6, %cst_9 {dimension_numbers = #tpu.dot_dimension_numbers<[1], [0], [0], [1], [0, 0, 1, 1], [], []>, precision = #tpu.contract_precision<fp32>} : vector<8x4xf32>, vector<4x8xf32>, vector<8x8xf32> -> vector<8x8xf32>
    %8 = arith.addf %3, %7 : vector<8x8xf32>
    %c0_10 = arith.constant 0 : index
    %c0_11 = arith.constant 0 : index
    %9 = vector.load %arg6[%c0_10, %c0_11] : memref<8x1xf32, #tpu.memory_space<vmem>>, vector<8x1xf32>
    %10 = vector.broadcast %9 : vector<8x1xf32> to vector<8x8xf32>
    %11 = arith.addf %8, %10 : vector<8x8xf32>
    %cst_12 = arith.constant 0.000000e+00 : f32
    %12 = vector.broadcast %cst_12 : f32 to vector<8x8xf32>
    %13 = arith.maximumf %11, %12 : vector<8x8xf32>
    %c0_13 = arith.constant 0 : index
    %c0_14 = arith.constant 0 : index
    %c0_15 = arith.constant 0 : index
    %14 = vector.load %arg7[%c0_13, %c0_14, %c0_15] : memref<1x8x8xf32, #tpu.memory_space<vmem>>, vector<1x8x8xf32>
    %15 = vector.shape_cast %14 : vector<1x8x8xf32> to vector<8x8xf32>
    %16 = vector.shape_cast %13 : vector<8x8xf32> to vector<1x8x8xf32>
    tpu.vector_store %arg7[%c0_13, %c0_14, %c0_15], %16 {strides = array<i32>} : memref<1x8x8xf32, #tpu.memory_space<vmem>>, vector<1x8x8xf32>,
    return
  }
  func.func @transform_0(%arg0: i32, %arg1: i32) -> (i32, i32, i32) {
    %c0_i32 = arith.constant 0 : i32
    %c0_i32_0 = arith.constant 0 : i32
    return %arg0, %c0_i32, %arg1 : i32, i32, i32
  }
  func.func @transform_1(%arg0: i32, %arg1: i32) -> (i32, i32, i32) {
    %c0_i32 = arith.constant 0 : i32
    %c0_i32_0 = arith.constant 0 : i32
    return %arg0, %c0_i32, %arg1 : i32, i32, i32
  }
  func.func @transform_2(%arg0: i32, %arg1: i32) -> (i32, i32) {
    %c0_i32 = arith.constant 0 : i32
    %c0_i32_0 = arith.constant 0 : i32
    %c0_i32_1 = arith.constant 0 : i32
    return %c0_i32, %c0_i32_0 : i32, i32
  }
  func.func @transform_3(%arg0: i32, %arg1: i32) -> (i32, i32) {
    %c0_i32 = arith.constant 0 : i32
    %c0_i32_0 = arith.constant 0 : i32
    %c0_i32_1 = arith.constant 0 : i32
    return %c0_i32, %c0_i32_0 : i32, i32
  }
  func.func @transform_4(%arg0: i32, %arg1: i32) -> (i32, i32) {
    %c0_i32 = arith.constant 0 : i32
    %c0_i32_0 = arith.constant 0 : i32
    %c0_i32_1 = arith.constant 0 : i32
    return %c0_i32, %c0_i32_0 : i32, i32
  }
  func.func @transform_5(%arg0: i32, %arg1: i32) -> (i32, i32, i32) {
    %c0_i32 = arith.constant 0 : i32
    %c0_i32_0 = arith.constant 0 : i32
    return %arg0, %c0_i32, %arg1 : i32, i32, i32
  }
}

</mosaic_0001>

<bundles_post_ra>
// kernel: temporal_conv_layer.1
= control target key start
LH: loop header
LB: loop body
LE: loop exit
PB: predicated region body
PF: predicated region fallthrough
CT: control target
= control target key end

     0   :  { %s1467_s18 = smov 0   ;;  %s1469_s19 = smov 0   ;;  %s1558_s0 = inlined_call_operand.vmem [shape: f32[2,4,8], index: 0, kind: input, shape index: {}]   ;;  %s1559_s1 = inlined_call_operand.vmem [shape: f32[2,4,8], index: 1, kind: input, shape index: {}]   ;;  %s1560_s2 = inlined_call_operand.vmem [shape: f32[8,4], index: 2, kind: input, shape index: {}]   ;;  %s1561_s3 = inlined_call_operand.vmem [shape: f32[8,4], index: 3, kind: input, shape index: {}]   ;;  %s1562_s4 = inlined_call_operand.vmem [shape: f32[8,1], index: 4, kind: input, shape index: {}]   ;;  %s1563_s5 = inlined_call_operand.vmem [shape: f32[2,8,8], index: 5, kind: output, shape index: {}]  }
   0x1   :  { %s1471_s20 = smov 0  }
   0x2 LB: > { %s27_s21 = sadd.s32 1, %s1428_s19  ;;  %p1292_p0 = scmp.ge.s32.totalorder %s1432_s20, 1  ;;  %s1432_s20 = sphi %s1471_s20, %s15_s20   ;;  %s1428_s19 = sphi %s1469_s19, %s1565_s19   ;;  %s1424_s18 = sphi %s1467_s18, %s1564_s18  }
   0x3   : > { %p29_p1 = scmp.ge.s32.totalorder %s27_s21, 2  ;;  %p219_p2 = scmp.lt.s32.totalorder %s1432_s20, 3 }
   0x5   : > { %s1567_s21 = smov (%p29_p1, %s27_s21), 0  ;;  %p220_p3 = pnand %p1292_p0, %p219_p2 }
   0x6   : > { %p258_p4 = scmp.lt.s32.totalorder (!%p220_p3), %s1424_s18, 1  ;;  %v279_v0 = vld [vmem:[%s1560_s2] sm:$0xff] (!%p220_p3)  ;;  %v1434_v2 = vmov (!%p220_p3), 0.0   ;;  %vm1435_vm0 = vmmov (!%p220_p3), 0   ;;  %vm283_vm1 = vcmask (!%p220_p3), 31744   ;;  %v1436_v7 = vmov (!%p220_p3), 0  }
   0x7   : > { %223 = sbr.rel (%p220_p3) target bundleno = 269 (0x10d), region = 40  ;;  %v281_v1 = vld [vmem:[%s1561_s3] sm:$0xff] (!%p220_p3)  ;;  %1322 = vmatprep.subr.mxu0 (!%p220_p3), %v1434_v2  ;;  %1324 = vmatprep.mubr.msk.f32.mxu0 (!%p220_p3), %vm1435_vm0, %v1434_v2  ;;  %v738_v6 = vsel (!%p220_p3), %vm283_vm1, %v279_v0, 0  ;;  %vm287_vm2 = vcmask (!%p220_p3), 1043456   ;;  %vm1197_vm3 = vcmask (!%p220_p3), 64512  }
   0x8   : > { %v1189_v3 = vld [vmem:[%s1562_s4] sm:$0xff] (!%p220_p3)  ;;  %v285_v4 = vsel (!%p220_p3), %vm283_vm1, %v281_v1, 0  ;;  %1327 = vmatprep.subr.mxu1 (!%p220_p3), %v1434_v2  ;;  %1329 = vmatprep.mubr.msk.f32.mxu1 (!%p220_p3), %vm1435_vm0, %v1434_v2  ;;  %v1509_v10 = vand.u32 (!%p220_p3), 4294901760, %v738_v6 }
   0x9   : > { %v357_v5 = vand.u32 (!%p220_p3), 4294901760, %v285_v4  ;;  %1409 = vset.pattern.permute.xlu0 (!%p220_p3), %v1436_v7 }
   0xa   : > { %1192 = vperm.xlu0 (!%p220_p3), %1409, %v1189_v3   ;;  %v810_v19 = vsub.f32 (!%p220_p3), %v738_v6, %v1509_v10 }
   0xb   : > { %v358_v8 = vsub.f32 (!%p220_p3), %v285_v4, %v357_v5 }
   0xc   : > { %v811_v24 = vand.u32 (!%p220_p3), 4294901760, %v810_v19 }
   0xd   : > { %v359_v13 = vand.u32 (!%p220_p3), 4294901760, %v358_v8 }
   0xe   : > { %s1569_s18 = smov (!%p258_p4, %s1424_s18), 1  ;;  %v812_v27 = vsub.f32 %v810_v19, %v811_v24 }
   0xf   : > { %s1293_s28 = sshll.u32 %s1569_s18, 2  ;;  %v360_v17 = vsub.f32 %v358_v8, %v359_v13  ;;  %s1295_s10 = sshll.u32 %s1569_s18, 3 }
  0x10   : > { %s271_s6 = scalar_lea.vmem %s1559_s1, %s1293_s28  ;;  %s264_s9 = scalar_lea.vmem %s1558_s0, %s1293_s28  ;;  %v813_v29 = vand.u32 4294901760, %v812_v27 }
  0x11   : > { %v282_v9 = vld [vmem:[%s271_s6] sm:$0xf]  ;;  %v361_v20 = vand.u32 4294901760, %v360_v17  ;;  %s278_s13 = scalar_lea.vmem %s1563_s5, %s1295_s10 }
  0x12   : > { %v280_v11 = vld [vmem:[%s264_s9] sm:$0xf]  ;;  %v289_v12 = vsel %vm287_vm2, %v282_v9, 0 }
  0x13   : > { %v741_v14 = vsel %vm287_vm2, %v280_v11, 0  ;;  %v292_v15 = vand.u32 4294901760, %v289_v12 }
  0x14   : > { %v744_v16 = vand.u32 4294901760, %v741_v14 }
  0x15   : > { %1323 = vmatpush3.msra.mxu0 %v292_v15  ;;  %v369_v18 = vsub.f32 %v289_v12, %v292_v15 }
  0x16   : > { %1332 = vmatprep.subr.mxu0 %v1434_v2  ;;  %v821_v22 = vsub.f32 %v741_v14, %v744_v16  ;;  %1325 = vmatmul.mubr.f32.vlgmr.msra.gmra.mrb[0].mxu0 %v361_v20 }
  0x17   : > { %v370_v21 = vand.u32 4294901760, %v369_v18  ;;  %1333 = vmatpush3.msra.mxu0 %v369_v18  ;;  %1334 = vmatprep.mubr.msk.f32.mxu0 %vm1435_vm0, %v1434_v2 }
  0x18   : > { %1342 = vmatprep.subr.mxu0 %v1434_v2  ;;  %v822_v26 = vand.u32 4294901760, %v821_v22 }
  0x19   : > { %v371_v23 = vsub.f32 %v369_v18, %v370_v21 }
  0x1a   : > { %1335 = vmatmul.mubr.f32.vlgmr.msra.gmra.mrb[2].mxu0 %v358_v8  ;;  %v823_v28 = vsub.f32 %v821_v22, %v822_v26 }
  0x1b   : > { %v372_v25 = vand.u32 4294901760, %v371_v23  ;;  %1343 = vmatpush3.msra.mxu0 %v370_v21  ;;  %1344 = vmatprep.mubr.msk.f32.mxu0 %vm1435_vm0, %v1434_v2 }
  0x1c   : > { %1352 = vmatprep.subr.mxu0 %v1434_v2  ;;  %v824_v30 = vand.u32 4294901760, %v823_v28 }
  0x1d   : > { %1328 = vmatpush3.msra.mxu1 %v372_v25 }
  0x1e   : > { %1330 = vmatmul.mubr.f32.vlgmr.msra.gmra.mrb[0].mxu1 %v357_v5  ;;  %1337 = vmatprep.subr.mxu1 %v1434_v2 }
  0x1f   : > { %1338 = vmatpush3.msra.mxu1 %v292_v15  ;;  %1339 = vmatprep.mubr.msk.f32.mxu1 %vm1435_vm0, %v1434_v2 }
  0x20   : > { %1347 = vmatprep.subr.mxu1 %v1434_v2  ;;  %1345 = vmatmul.mubr.f32.vlgmr.msra.gmra.mrb[4].mxu0 %v357_v5 }
  0x21   : > { %1353 = vmatpush3.msra.mxu0 %v744_v16  ;;  %1354 = vmatprep.mubr.msk.f32.mxu0 %vm1435_vm0, %v1434_v2 }
  0x22   : > { %1340 = vmatmul.mubr.f32.vlgmr.msra.gmra.mrb[2].mxu1 %v359_v13  ;;  %1362 = vmatprep.subr.mxu0 %v1434_v2 }
  0x23   : > { %1348 = vmatpush3.msra.mxu1 %v292_v15  ;;  %1349 = vmatprep.mubr.msk.f32.mxu1 %vm1435_vm0, %v1434_v2 }
  0x24   : > { %1357 = vmatprep.subr.mxu1 %v1434_v2  ;;  %1355 = vmatmul.mubr.f32.vlgmr.msra.gmra.mrb[6].mxu0 %v813_v29 }
  0x25   : > { %1363 = vmatpush3.msra.mxu0 %v821_v22  ;;  %1364 = vmatprep.mubr.msk.f32.mxu0 %vm1435_vm0, %v1434_v2 }
  0x26   : > { %1350 = vmatmul.mubr.f32.vlgmr.msra.gmra.mrb[4].mxu1 %v357_v5  ;;  %1372 = vmatprep.subr.mxu0 %v1434_v2 }
  0x27   : > { %1358 = vmatpush3.msra.mxu1 %v824_v30  ;;  %1359 = vmatprep.mubr.msk.f32.mxu1 %vm1435_vm0, %v1434_v2 }
  0x28   : > { %1367 = vmatprep.subr.mxu1 %v1434_v2  ;;  %1365 = vmatmul.mubr.f32.vlgmr.msra.gmra.mrb[8].mxu0 %v810_v19 }
  0x29   : > { %1373 = vmatpush3.msra.mxu0 %v822_v26  ;;  %1374 = vmatprep.mubr.msk.f32.mxu0 %vm1435_vm0, %v1434_v2 }
  0x2a   : > { %1360 = vmatmul.mubr.f32.vlgmr.msra.gmra.mrb[6].mxu1 %v1509_v10 }
  0x2b   : > { %1368 = vmatpush3.msra.mxu1 %v744_v16  ;;  %1369 = vmatprep.mubr.msk.f32.mxu1 %vm1435_vm0, %v1434_v2 }
  0x2c   : > { %1377 = vmatprep.subr.mxu1 %v1434_v2  ;;  %1375 = vmatmul.mubr.f32.vlgmr.msra.gmra.mrb[10].mxu0 %v1509_v10 }
  0x2e   : > { %1370 = vmatmul.mubr.f32.vlgmr.msra.gmra.mrb[8].mxu1 %v811_v24 }
  0x2f   : > { %1378 = vmatpush3.msra.mxu1 %v744_v16  ;;  %1379 = vmatprep.mubr.msk.f32.mxu1 %vm1435_vm0, %v1434_v2 }
  0x32   : > { %1380 = vmatmul.mubr.f32.vlgmr.msra.gmra.mrb[10].mxu1 %v1509_v10 }
  0x89   : > { %v1193_v0 = vpop.permute.xlu0 %1192 }
  0xe9   : > { %v363_v31 = vpop.f32.mrb[0].mxu0 }
  0xea   : > { %v1326_v32 = vpop.f32.mrb[1].mxu0 }
  0xed   : > { %v513_v33 = vpop.f32.mrb[2].mxu0 }
  0xee   : > { %v1336_v34 = vpop.f32.mrb[3].mxu0 }
  0xf1   : > { %v439_v35 = vpop.f32.mrb[0].mxu1 }
  0xf2   : > { %v440_v36 = vadd.f32 %v439_v35, %v363_v31  ;;  %v1331_v37 = vpop.f32.mrb[1].mxu1 }
  0xf3   : > { %v661_v39 = vpop.f32.mrb[4].mxu0 }
  0xf4   : > { %v514_v38 = vadd.f32 %v513_v33, %v440_v36  ;;  %v1346_v41 = vpop.f32.mrb[5].mxu0 }
  0xf5   : > { %v587_v40 = vpop.f32.mrb[2].mxu1 }
  0xf6   : > { %v588_v42 = vadd.f32 %v587_v40, %v514_v38  ;;  %v1341_v43 = vpop.f32.mrb[3].mxu1 }
  0xf7   : > { %v815_v45 = vpop.f32.mrb[6].mxu0 }
  0xf8   : > { %v662_v44 = vadd.f32 %v661_v39, %v588_v42  ;;  %v1356_v47 = vpop.f32.mrb[7].mxu0 }
  0xf9   : > { %v733_v46 = vpop.f32.mrb[4].mxu1 }
  0xfa   : > { %v734_v48 = vadd.f32 %v733_v46, %v662_v44  ;;  %v1351_v49 = vpop.f32.mrb[5].mxu1 }
  0xfb   : > { %v965_v51 = vpop.f32.mrb[8].mxu0 }
  0xfc   : > { %v816_v50 = vadd.f32 %v815_v45, %v734_v48  ;;  %v1366_v53 = vpop.f32.mrb[9].mxu0 }
  0xfd   : > { %v891_v52 = vpop.f32.mrb[6].mxu1 }
  0xfe   : > { %v892_v54 = vadd.f32 %v891_v52, %v816_v50  ;;  %v1361_v55 = vpop.f32.mrb[7].mxu1 }
  0xff   : > { %v1113_v57 = vpop.f32.mrb[10].mxu0 }
 0x100   : > { %v966_v56 = vadd.f32 %v965_v51, %v892_v54  ;;  %v1376_v59 = vpop.f32.mrb[11].mxu0 }
 0x101   : > { %v1039_v58 = vpop.f32.mrb[8].mxu1 }
 0x102   : > { %v1040_v60 = vadd.f32 %v1039_v58, %v966_v56  ;;  %v1371_v61 = vpop.f32.mrb[9].mxu1 }
 0x104   : > { %v1114_v62 = vadd.f32 %v1113_v57, %v1040_v60 }
 0x105   : > { %v1185_v63 = vpop.f32.mrb[10].mxu1 }
 0x106   : > { %v1186_v1 = vadd.f32 %v1185_v63, %v1114_v62  ;;  %v1381_v2 = vpop.f32.mrb[11].mxu1 }
 0x108   : > { %v1195_v3 = vadd.f32 %v1193_v0, %v1186_v1 }
 0x10a   : > { %v1196_v4 = vmax.f32 %v1195_v3, 0.0 }
 0x10c   : > { %1198 = vst.msk [vmem:[%s278_s13] sm:$0xff] %vm1197_vm3, %v1196_v4 }
 0x10d PF: > { %s15_s20 = sadd.s32 1, %s1432_s20   ;;  %s1564_s18 = smov %s1428_s19 }
 0x10e   : > { %p12_p5 = scmp.ge.s32.totalorder %s15_s20, 4   ;;  %s1565_s19 = smov %s1567_s21 }
 0x110   :  { %14 = sbr.rel (!%p12_p5) target bundleno = 2 (0x2), region = 73 }

</bundles_post_ra>
